<compile_context>
chip_gen: v7x
topology: tpu7x:2x2x1
jax: 0.10.0
libtpu: 0.0.40
codegen_flags: <defaults>
</compile_context>

<pallas_src>
import math

import jax
import jax.numpy as jnp
from jax.experimental import pallas as pl
from jax.experimental.pallas import tpu as pltpu


# ----------------------------- Linear (x @ W + b) -----------------------------
def _linear_kernel(x_ref, w_ref, b_ref, o_ref):
    # bf16 operands on the MXU, f32 accumulation, f32 bias add.
    acc = jnp.dot(x_ref[...].astype(jnp.bfloat16), w_ref[...],
                  preferred_element_type=jnp.float32)
    o_ref[...] = (acc + b_ref[...]).astype(o_ref.dtype)


def pallas_linear(x, w, b, *, tm=512, out_dtype=jnp.bfloat16):
    """x: (N, d_in) f32/bf16, w: (d_in, d_out) bf16, b: (1, d_out) f32.

    Row-tiled (tm rows per grid step, "parallel") so the activation streams
    through VMEM with double-buffered DMA; weights/bias stay resident
    (constant index_map).  With bf16 weights + bf16 outputs, tm=512 fits the
    16 MiB v5e scoped-VMEM default for typical d_model.
    """
    N, d_in = x.shape
    d_out = w.shape[1]
    tm = min(tm, N)
    grid = (pl.cdiv(N, tm),)
    return pl.pallas_call(
        _linear_kernel,
        out_shape=jax.ShapeDtypeStruct((N, d_out), out_dtype),
        grid=grid,
        in_specs=[
            pl.BlockSpec((tm, d_in), lambda i: (i, 0)),
            pl.BlockSpec((d_in, d_out), lambda i: (0, 0)),
            pl.BlockSpec((1, d_out), lambda i: (0, 0)),
        ],
        out_specs=pl.BlockSpec((tm, d_out), lambda i: (i, 0)),
        compiler_params=pltpu.CompilerParams(dimension_semantics=("parallel",)),
    )(x, w, b)


# ------------------------- Anomaly attention kernel ---------------------------
def _anomaly_attn_kernel(q_ref, k_ref, v_ref, isig_ref,
                         out_ref, series_ref, prior_ref):
    L, S = series_ref.shape[2], series_ref.shape[3]
    E = q_ref.shape[3]

    q = q_ref[0, 0]            # (L, E) bf16
    k = k_ref[0, 0]            # (S, E) bf16
    v = v_ref[0, 0]            # (S, D) bf16
    inv_sig = isig_ref[0, 0]   # (L, 1) f32  (= 1 / transformed sigma)

    scale = 1.0 / math.sqrt(E)
    inv_sqrt_2pi = 1.0 / math.sqrt(2.0 * math.pi)

    # scores = scale * q @ k^T  (contract on E; no materialized k.T).
    scores = jax.lax.dot_general(
        q, k, (((1,), (1,)), ((), ())),
        preferred_element_type=jnp.float32) * scale            # (L, S) f32

    # series = softmax(scores, axis=-1); approx reciprocal -> free EUP slot.
    m = jnp.max(scores, axis=-1, keepdims=True)
    e = jnp.exp(scores - m)
    denom = jnp.sum(e, axis=-1, keepdims=True)
    series = e * pl.reciprocal(denom, approx=True)

    # out = series @ v  (bf16 operands, f32 accumulation).
    out = jax.lax.dot_general(
        series.astype(jnp.bfloat16), v, (((1,), (0,)), ((), ())),
        preferred_element_type=jnp.float32)                     # (L, D) f32

    # Gaussian prior: 1/(sqrt(2*pi)*sigma) * exp(-|i-j|^2 / (2*sigma^2)).
    # |i-j|^2 rebuilt from iotas (cheap VPU work, no resident (L,S) input).
    rows = jax.lax.broadcasted_iota(jnp.int32, (L, S), 0)
    cols = jax.lax.broadcasted_iota(jnp.int32, (L, S), 1)
    diff = (rows - cols).astype(jnp.float32)
    prior = (inv_sqrt_2pi * inv_sig) * jnp.exp(
        (-0.5 * diff * diff) * (inv_sig * inv_sig))             # (L, S) f32

    out_ref[0, 0] = out.astype(out_ref.dtype)
    series_ref[0, 0] = series.astype(series_ref.dtype)
    prior_ref[0, 0] = prior.astype(prior_ref.dtype)


def anomaly_attention(q, k, v, inv_sig):
    """q: (B,H,L,E) bf16, k: (B,H,S,E) bf16, v: (B,H,S,D) bf16,
    inv_sig: (B,H,L,1) f32.  Returns (out (B,H,L,D) bf16, series, prior f32)."""
    B, H, L, E = q.shape
    S = k.shape[2]
    D = v.shape[3]

    out_shapes = (
        jax.ShapeDtypeStruct((B, H, L, D), jnp.bfloat16),   # attention output
        jax.ShapeDtypeStruct((B, H, L, S), jnp.float32),    # series
        jax.ShapeDtypeStruct((B, H, L, S), jnp.float32),    # prior
    )
    return pl.pallas_call(
        _anomaly_attn_kernel,
        out_shape=out_shapes,
        grid=(B, H),
        in_specs=[
            pl.BlockSpec((1, 1, L, E), lambda b, h: (b, h, 0, 0)),
            pl.BlockSpec((1, 1, S, E), lambda b, h: (b, h, 0, 0)),
            pl.BlockSpec((1, 1, S, D), lambda b, h: (b, h, 0, 0)),
            pl.BlockSpec((1, 1, L, 1), lambda b, h: (b, h, 0, 0)),
        ],
        out_specs=(
            pl.BlockSpec((1, 1, L, D), lambda b, h: (b, h, 0, 0)),
            pl.BlockSpec((1, 1, L, S), lambda b, h: (b, h, 0, 0)),
            pl.BlockSpec((1, 1, L, S), lambda b, h: (b, h, 0, 0)),
        ),
        compiler_params=pltpu.CompilerParams(
            dimension_semantics=("parallel", "parallel")),
    )(q, k, v, inv_sig)


# ----------------------------- Full AttentionLayer ----------------------------
def init_params(key, d_model, n_heads, d_keys=None, d_values=None):
    d_keys = d_keys or d_model // n_heads
    d_values = d_values or d_model // n_heads
    ks = jax.random.split(key, 10)
    s = 0.02

    def lin(kw, kb, d_in, d_out):
        return (jax.random.normal(kw, (d_in, d_out), jnp.float32) * s,
                jax.random.normal(kb, (1, d_out), jnp.float32) * s)

    wq, bq = lin(ks[0], ks[1], d_model, d_keys * n_heads)
    wk, bk = lin(ks[2], ks[3], d_model, d_keys * n_heads)
    wv, bv = lin(ks[4], ks[5], d_model, d_values * n_heads)
    ws, bs = lin(ks[6], ks[7], d_model, n_heads)
    wo, bo = lin(ks[8], ks[9], n_heads * d_values, d_model)

    # Fused [Wq|Wk|Wv|Wsigma] built ONCE here (not per forward call), stored as
    # bf16 MXU operands; biases stay f32 (added after f32 accumulation).
    w_qkvs = jnp.concatenate([wq, wk, wv, ws], axis=1).astype(jnp.bfloat16)
    b_qkvs = jnp.concatenate([bq, bk, bv, bs], axis=1)

    bf = jnp.bfloat16
    return dict(w_qkvs=w_qkvs, b_qkvs=b_qkvs,
                wq=wq.astype(bf), bq=bq, wk=wk.astype(bf), bk=bk,
                wv=wv.astype(bf), bv=bv, ws=ws.astype(bf), bs=bs,
                wo=wo.astype(bf), bo=bo,
                n_heads=n_heads, d_keys=d_keys, d_values=d_values)


def attention_layer_forward(params, queries, keys, values):
    B, L, d_model = queries.shape
    S = keys.shape[1]
    H = params["n_heads"]
    E = params["d_keys"]
    D = params["d_values"]

    q_flat = queries.reshape(B * L, d_model)

    # Self-attention (the Anomaly Transformer always calls attn(x, x, x)):
    # one fused projection = one HBM pass over the activation.
    if (queries is keys) and (keys is values):
        qkvs = pallas_linear(q_flat, params["w_qkvs"], params["b_qkvs"])
        q = qkvs[:, :H * E]
        k = qkvs[:, H * E:2 * H * E]
        v = qkvs[:, 2 * H * E:2 * H * E + H * D]
        sg = qkvs[:, 2 * H * E + H * D:]
    else:
        q = pallas_linear(q_flat, params["wq"], params["bq"])
        sg = pallas_linear(q_flat, params["ws"], params["bs"])
        k_flat = keys.reshape(B * S, d_model)
        k = pallas_linear(k_flat, params["wk"], params["bk"])
        v = pallas_linear(values.reshape(B * S, d_model),
                          params["wv"], params["bv"])

    # Head-major (B, H, L, E) layout: every attention block equals the full
    # last-two array dims (always (8,128)-legal), one grid step per (b, h).
    q = q.reshape(B, L, H, E).transpose(0, 2, 1, 3)
    k = k.reshape(B, S, H, E).transpose(0, 2, 1, 3)
    v = v.reshape(B, S, H, D).transpose(0, 2, 1, 3)

    # Sigma transform hoisted out of the kernel (tiny (B, H, L) tensor; XLA
    # fuses it): sigma_t = 3 ** (sigmoid(5*sigma) + 1e-5) - 1.
    sg = sg.astype(jnp.float32).reshape(B, L, H).transpose(0, 2, 1)   # (B,H,L)
    sig_t = jnp.power(3.0, jax.nn.sigmoid(5.0 * sg) + 1e-5) - 1.0
    inv_sig = (1.0 / sig_t)[..., None]                                # (B,H,L,1)

    out_bhld, series, prior = anomaly_attention(q, k, v, inv_sig)

    # Output projection on (B*L, H*D); final layer output in f32.
    out_flat = out_bhld.transpose(0, 2, 1, 3).reshape(B * L, H * D)
    final = pallas_linear(out_flat, params["wo"], params["bo"],
                          out_dtype=jnp.float32).reshape(B, L, d_model)

    # Reference returns the transformed sigma broadcast to (B, H, L, S);
    # broadcast in the wrapper instead of paying S x kernel writeback.
    sigma = jnp.broadcast_to(sig_t[..., None], (B, H, L, S))
    return final, series, prior, sigma


if __name__ == "__main__":
    B, L, d_model, H = 2, 16, 32, 4   # S == L (win_size), self-attention
    key = jax.random.PRNGKey(0)
    kx, kp = jax.random.split(key, 2)

    x = jax.random.normal(kx, (B, L, d_model), jnp.float32)
    params = init_params(kp, d_model, H)

    out, series, prior, sigma = attention_layer_forward(params, x, x, x)
    jax.block_until_ready((out, series, prior, sigma))

    assert out.shape == (B, L, d_model)
    assert series.shape == (B, H, L, L)
    assert prior.shape == (B, H, L, L)
    assert sigma.shape == (B, H, L, L)
    assert bool(jnp.all(jnp.isfinite(out)))
    print("KERNEL_OK")
</pallas_src>

<mosaic_0001>
module attributes {stable_mosaic.version = 11 : i64} {
  func.func @_linear_kernel(%arg0: i32, %arg1: memref<32x32xf32, #tpu.memory_space<vmem>>, %arg2: memref<32x100xbf16, #tpu.memory_space<vmem>>, %arg3: memref<1x100xf32, #tpu.memory_space<vmem>>, %arg4: memref<32x100xbf16, #tpu.memory_space<vmem>>) attributes {dimension_semantics = [#tpu.dimension_semantics<parallel>], iteration_bounds = array<i64: 1>, scalar_prefetch = 0 : i64, scratch_operands = 0 : i64, tpu.core_type = #tpu.core_type<tc>, window_params = [{transform_indices = @transform_0, window_bounds = array<i64: 32, 32>}, {pipeline_mode = #tpu.pipeline_mode<synchronous>, transform_indices = @transform_1, window_bounds = array<i64: 32, 100>}, {pipeline_mode = #tpu.pipeline_mode<synchronous>, transform_indices = @transform_2, window_bounds = array<i64: 1, 100>}, {transform_indices = @transform_3, window_bounds = array<i64: 32, 100>}]} {
    %c0 = arith.constant 0 : index
    %c0_0 = arith.constant 0 : index
    %0 = vector.load %arg1[%c0, %c0_0] : memref<32x32xf32, #tpu.memory_space<vmem>>, vector<32x32xf32>
    %1 = arith.truncf %0 : vector<32x32xf32> to vector<32x32xbf16>
    %c0_1 = arith.constant 0 : index
    %c0_2 = arith.constant 0 : index
    %2 = vector.load %arg2[%c0_1, %c0_2] : memref<32x100xbf16, #tpu.memory_space<vmem>>, vector<32x100xbf16>
    %cst = arith.constant dense<0.000000e+00> : vector<32x100xf32>
    %3 = tpu.matmul %1, %2, %cst {dimension_numbers = #tpu.dot_dimension_numbers<[1], [0], [0], [1], [0, 0, 1, 1], [], []>} : vector<32x32xbf16>, vector<32x100xbf16>, vector<32x100xf32> -> vector<32x100xf32>
    %c0_3 = arith.constant 0 : index
    %c0_4 = arith.constant 0 : index
    %4 = vector.load %arg3[%c0_3, %c0_4] : memref<1x100xf32, #tpu.memory_space<vmem>>, vector<1x100xf32>
    %5 = vector.broadcast %4 : vector<1x100xf32> to vector<32x100xf32>
    %6 = arith.addf %3, %5 : vector<32x100xf32>
    %7 = arith.truncf %6 : vector<32x100xf32> to vector<32x100xbf16>
    %c0_5 = arith.constant 0 : index
    %c0_6 = arith.constant 0 : index
    %8 = vector.load %arg4[%c0_5, %c0_6] : memref<32x100xbf16, #tpu.memory_space<vmem>>, vector<32x100xbf16>
    tpu.vector_store %arg4[%c0_5, %c0_6], %7 {strides = array<i32>} : memref<32x100xbf16, #tpu.memory_space<vmem>>, vector<32x100xbf16>,
    return
  }
  func.func @transform_0(%arg0: i32) -> (i32, i32) {
    %c0_i32 = arith.constant 0 : i32
    %c0_i32_0 = arith.constant 0 : i32
    return %arg0, %c0_i32 : i32, i32
  }
  func.func @transform_1(%arg0: i32) -> (i32, i32) {
    %c0_i32 = arith.constant 0 : i32
    %c0_i32_0 = arith.constant 0 : i32
    %c0_i32_1 = arith.constant 0 : i32
    return %c0_i32, %c0_i32_0 : i32, i32
  }
  func.func @transform_2(%arg0: i32) -> (i32, i32) {
    %c0_i32 = arith.constant 0 : i32
    %c0_i32_0 = arith.constant 0 : i32
    %c0_i32_1 = arith.constant 0 : i32
    return %c0_i32, %c0_i32_0 : i32, i32
  }
  func.func @transform_3(%arg0: i32) -> (i32, i32) {
    %c0_i32 = arith.constant 0 : i32
    %c0_i32_0 = arith.constant 0 : i32
    return %arg0, %c0_i32 : i32, i32
  }
}

</mosaic_0001>

<bundles_post_ra>
// kernel: tpu_custom_call.1
= control target key start
LH: loop header
LB: loop body
LE: loop exit
PB: predicated region body
PF: predicated region fallthrough
CT: control target
= control target key end

     0   :  { %8 = vsyncpa [#allocation3], 0  ;;  %s350_s0 = inlined_call_operand.hbm [shape: f32[32,32], index: 0, kind: input, shape index: {}]   ;;  %s351_s1 = inlined_call_operand.hbm [shape: bf16[32,100], index: 1, kind: input, shape index: {}]   ;;  %s352_s2 = inlined_call_operand.vmem [shape: f32[1,100], index: 2, kind: input, shape index: {}]   ;;  %s353_s3 = inlined_call_operand.hbm [shape: bf16[32,100], index: 3, kind: output, shape index: {}]  }
   0x1   :  { %9 = vsyncpa [#allocation6], 0 }
   0x2   :  { %10 = vsyncpa [#allocation4], 0  ;;  %s274_s12 = smov [#allocation2]   ;;  %s202_s16 = scalar_lea.hbm %s350_s0, 512 }
   0x3   :  { %s16_s13 = sshll.u32 %s274_s12, 4  ;;  %p203_p0 = scmp.ne.s32.totalorder %s350_s0, %s202_s16  ;;  %s17_s13 = int_to_ptr.vmem [resolvable:$true] %s16_s13 }
   0x4   :  { %p206_p1 = scmp.lt.u32.totalorder %s202_s16, %s350_s0 }
   0x6   :  { %p208_p2 = pnand %p206_p1, %p203_p0 }
   0x8   :  { %211 = shalt.err (!%p208_p2)
}
   0x9   :  { %s212_s21 = scalar_lea.vmem %s17_s13, 512  ;;  %p217_p4 = scmp.lt.s32.totalorder %s17_s13, %s17_s13 }
   0xa   :  { %p213_p3 = scmp.ne.s32.totalorder %s17_s13, %s212_s21  ;;  %p218_p5 = scmp.lt.s32.totalorder %s212_s21, %s212_s21 }
   0xc   :  { %p219_p6 = por %p218_p5, %p217_p4 }
   0xe   :  { %p220_p7 = pnand %p219_p6, %p213_p3 }
  0x10   :  { %223 = shalt.err (!%p220_p7)
}
  0x11   :  { %s275_s22 = smov 128   ;;  %s276_s23 = smov 8  }
  0x12   :  { %22 = dma.hbm_to_vmem [thread:$0]  %s350_s0, 512, %s17_s13, [#allocation3], %s275_s22, %s275_s22, %s276_s23  }
  0x13   :  { %s277_s26 = smov [#allocation5]   ;;  %s224_s30 = scalar_lea.hbm %s351_s1, 256 }
  0x14   :  { %s28_s27 = sshll.u32 %s277_s26, 4  ;;  %p225_p8 = scmp.ne.s32.totalorder %s351_s1, %s224_s30  ;;  %s29_s27 = int_to_ptr.vmem [resolvable:$true] %s28_s27 }
  0x15   :  { %p228_p9 = scmp.lt.u32.totalorder %s224_s30, %s351_s1 }
  0x17   :  { %p230_p10 = pnand %p228_p9, %p225_p8 }
  0x19   :  { %233 = shalt.err (!%p230_p10)
}
  0x1a   :  { %s234_s8 = scalar_lea.vmem %s29_s27, 256  ;;  %p239_p12 = scmp.lt.s32.totalorder %s29_s27, %s29_s27 }
  0x1b   :  { %p235_p11 = scmp.ne.s32.totalorder %s29_s27, %s234_s8  ;;  %p240_p13 = scmp.lt.s32.totalorder %s234_s8, %s234_s8 }
  0x1d   :  { %p241_p0 = por %p240_p13, %p239_p12 }
  0x1f   :  { %p242_p1 = pnand %p241_p0, %p235_p11 }
  0x21   :  { %245 = shalt.err (!%p242_p1)
}
  0x22   :  { %s278_s0 = smov 64   ;;  %s279_s9 = smov 4  }
  0x23   :  { %34 = dma.hbm_to_vmem [thread:$0]  %s351_s1, 256, %s29_s27, [#allocation6], %s278_s0, %s278_s0, %s279_s9  }
  0x24   :  { %268 = dma.done.wait [#allocation3], 512  }
  0x25   :  { %269 = vsyncadd [#allocation3], 4294966784 }
  0x26   :  { %270 = dma.done.wait [#allocation6], 256  }
  0x27   :  { %271 = vsyncadd [#allocation6], 4294967040  ;;  %v200_v0 = vld [vmem:[#allocation5] sm:$0xff]   ;;  %v201_v1 = vld [vmem:[#allocation5 + $0x8] sm:$0xff]   ;;  %vm73_vm0 = vcmask 261120   ;;  %vm145_vm1 = vcmask 814080  }
  0x28   :  { %185 = vmatprep.subr.bf16.mxu0 %v200_v0  ;;  %v44_v2 = vld [vmem:[#allocation2] sm:$0xff]  ;;  %v45_v3 = vld [vmem:[#allocation2 + $0x8] sm:$0xff]  ;;  %v46_v5 = vld [vmem:[#allocation2 + $0x10] sm:$0xff]  ;;  %s280_s13 = smov [#allocation7]  }
  0x29   :  { %186 = vmatpush3.bf16.msra.mxu0 %v200_v0  ;;  %v48_v4 = vpack.c.bf16 %v45_v3, %v44_v2  ;;  %v47_v6 = vld [vmem:[#allocation2 + $0x18] sm:$0xff]  ;;  %v168_v8 = vld [vmem:[%s352_s2] ss:$0 sm:$0xff]  ;;  %s155_s14 = sshll.u32 %s280_s13, 4  ;;  %s156_s14 = int_to_ptr.vmem [resolvable:$true] %s155_s14 }
  0x2a   :  { %187 = vmatprep.subr.bf16.mxu0 %v201_v1  ;;  %v49_v7 = vpack.c.bf16 %v47_v6, %v46_v5  ;;  %s246_s2 = scalar_lea.vmem %s156_s14, 256  ;;  %p251_p3 = scmp.lt.s32.totalorder %s156_s14, %s156_s14 }
  0x2b   :  { %189 = vmatprep.mubr.msk.bf16.mxu0 %vm73_vm0, %v48_v4  ;;  %p247_p2 = scmp.ne.s32.totalorder %s156_s14, %s246_s2  ;;  %p252_p4 = scmp.lt.s32.totalorder %s246_s2, %s246_s2 }
  0x2d   :  { %188 = vmatpush3.bf16.msra.mxu0 %v201_v1  ;;  %p253_p5 = por %p252_p4, %p251_p3 }
  0x2f   :  { %p254_p6 = pnand %p253_p5, %p247_p2 }
  0x30   :  { %190 = vmatmul.mubr.msk.bf16.vlgmr.msra.gmra.mrb[0].mxu0 %vm73_vm0, %v49_v7 }
 0x103   :  { %v191_v9 = vpop.f32.mrb[0].mxu0 }
 0x104   :  { %v123_v10 = vadd.f32 %v191_v9, %v168_v8  ;;  %v114_v11 = vpop.f32.mrb[1].mxu0 }
 0x105   :  { %v115_v12 = vadd.f32 %v168_v8, %v114_v11  ;;  %v192_v13 = vpop.f32.mrb[2].mxu0 }
 0x106   :  { %v179_v14 = vpack.c.bf16 %v123_v10, %v123_v10  ;;  %v126_v15 = vadd.f32 %v192_v13, %v168_v8  ;;  %v117_v16 = vpop.f32.mrb[3].mxu0 }
 0x107   :  { %v177_v17 = vpack.c.bf16 %v115_v12, %v115_v12  ;;  %v118_v18 = vadd.f32 %v168_v8, %v117_v16 }
 0x108   :  { %148 = vst.msk [vmem:[#allocation7 + $0x8] sm:$0xf] %vm145_vm1, %v179_v14  ;;  %v180_v19 = vpack.c.bf16 %v126_v15, %v126_v15 }
 0x109   :  { %146 = vst.msk [vmem:[#allocation7] sm:$0xf] %vm145_vm1, %v177_v17  ;;  %v178_v20 = vpack.c.bf16 %v118_v18, %v118_v18 }
 0x10a   :  { %149 = vst.msk [vmem:[#allocation7 + $0xc] sm:$0xf] %vm145_vm1, %v180_v19 }
 0x10b   :  { %147 = vst.msk [vmem:[#allocation7 + $0x4] sm:$0xf] %vm145_vm1, %v178_v20 }
 0x10c   :  { %257 = shalt.err (!%p254_p6)
}
 0x10d   :  { %s258_s17 = scalar_lea.hbm %s353_s3, 256 }
 0x10e   :  { %p259_p7 = scmp.ne.s32.totalorder %s353_s3, %s258_s17  ;;  %p262_p8 = scmp.lt.u32.totalorder %s258_s17, %s353_s3 }
 0x110   :  { %p264_p9 = pnand %p262_p8, %p259_p7 }
 0x112   :  { %267 = shalt.err (!%p264_p9)
}
 0x113   :  { %161 = dma.vmem_to_hbm [thread:$0]  %s156_s14, 256, %s353_s3, [#allocation4], %s278_s0, %s278_s0, %s279_s9  }
 0x114   :  { %272 = dma.done.wait [#allocation4], 256  }
 0x115   :  { %273 = vsyncadd [#allocation4], 4294967040 }
 0x116   :  { %165 = vsyncpa [#allocation3], 1 }
 0x117   :  { %166 = vsyncpa [#allocation6], 1 }
 0x118   :  { %167 = vsyncpa [#allocation4], 1 }

</bundles_post_ra>
